<compile_context>
chip_gen: v5e
topology: v5e:2x2
jax: 0.10.0
libtpu: 0.0.40
codegen_flags: <defaults>
</compile_context>

<pallas_src>
import functools

import jax
import jax.numpy as jnp
from jax.experimental import pallas as pl
from jax.experimental.pallas import tpu as pltpu


def _ce_label_smooth_kernel(logits_ref, targets_ref, partial_ref, *,
                            epsilon: float, num_classes: int,
                            n_total: int, tile_n: int):
    """One batch tile: per-row label-smoothed CE reduced to a tile partial sum.

    per-row loss = lse - sum_c w_c * shifted_c  with
        w_c = eps/C + (1 - eps) * [c == target],
    algebraically identical to -(1-eps)*logp[t] - (eps/C)*sum_c logp_c.
    """
    i = pl.program_id(0)

    x = logits_ref[...].astype(jnp.float32)              # (tile_n, C)
    t = targets_ref[...]                                  # (tile_n, 1) int32
    tn, c = x.shape

    # Numerically stable log-sum-exp over the (logical) class axis. The block's
    # class dim equals the true C, so no lane-validity masking is needed:
    # Mosaic masks its internal lane padding in the reductions.
    row_max = jnp.max(x, axis=1, keepdims=True)            # (tile_n, 1)
    shifted = x - row_max
    exp_sum = jnp.sum(jnp.exp(shifted), axis=1, keepdims=True)
    lse = jnp.log(exp_sum)                                  # (tile_n, 1)

    # Single weighted row reduction (replaces separate sum(log_probs) and
    # log_probs[target] reductions). The (1, C) iota broadcasts over sublanes,
    # the (tile_n, 1) target column broadcasts over lanes.
    class_ids = jax.lax.broadcasted_iota(jnp.int32, (1, c), 1)
    w_miss = jnp.float32(epsilon / num_classes)
    w_hit = jnp.float32(epsilon / num_classes + (1.0 - epsilon))
    w = jnp.where(class_ids == t, w_hit, w_miss)             # (tile_n, C)
    per_row = lse - jnp.sum(w * shifted, axis=1, keepdims=True)  # (tile_n, 1)

    # Ragged last tile: rows past the true batch size read uninitialized HBM.
    # All math above is strictly per-row, and jnp.where is a true select, so
    # any garbage/NaN in masked rows is discarded before the tile reduction.
    row_ids = jax.lax.broadcasted_iota(jnp.int32, (tn, 1), 0) + i * tile_n
    per_row = jnp.where(row_ids < n_total, per_row, 0.0)

    # Lane-dense (1, 1, 128) partial output: tile sum in lane 0, zeros elsewhere.
    tile_sum = jnp.sum(per_row)
    lanes = jax.lax.broadcasted_iota(jnp.int32, (1, 1, 128), 2)
    partial_ref[...] = jnp.where(lanes == 0, tile_sum, jnp.float32(0.0))


def cross_entropy_label_smooth(logits: jax.Array, targets: jax.Array,
                               num_classes: int, epsilon: float) -> jax.Array:
    """logits: (N, num_classes) float (f32 or bf16); targets: (N,) int class ids."""
    n, c = logits.shape
    assert c == num_classes

    itemsize = jnp.dtype(logits.dtype).itemsize

    # VMEM footprint per batch row: a lane-padded logits row plus the
    # lane-padded (tile_n, 1) int32 targets column (128 lanes * 4 B).
    c_vmem = pl.cdiv(c, 128) * 128
    per_row_bytes = c_vmem * itemsize + 128 * 4

    # Largest tile whose double-buffered inputs stay ~<=12 MiB: fits the
    # *default* scoped VMEM on every generation (v5e 16 MiB, v6e/v7x 32 MiB
    # scoped; v7x 64 MiB physical) without needing vmem_limit_bytes.
    budget_bytes = 12 * 1024 * 1024
    tile_n = max(8, (budget_bytes // (2 * per_row_bytes) // 8) * 8)
    # Keep >=2 grid steps when possible so the "parallel" batch axis can shard
    # across v7x's two TensorCores (no effect on v5e/v6e: 1 TC per chip).
    two_way = max(8, pl.cdiv(pl.cdiv(n, 2), 8) * 8)
    tile_n = int(min(tile_n, two_way))

    num_tiles = pl.cdiv(n, tile_n)

    targets2d = targets.astype(jnp.int32).reshape(n, 1)

    kernel = functools.partial(_ce_label_smooth_kernel,
                               epsilon=float(epsilon),
                               num_classes=int(num_classes),
                               n_total=int(n),
                               tile_n=int(tile_n))

    cost = pl.CostEstimate(
        flops=int(8 * n * c),
        transcendentals=int(n * c),
        bytes_accessed=int(n * c * itemsize + n * 4 + num_tiles * 128 * 4))

    partials = pl.pallas_call(
        kernel,
        out_shape=jax.ShapeDtypeStruct((num_tiles, 1, 128), jnp.float32),
        grid=(num_tiles,),
        in_specs=[
            # Full class dim as the block's last dim (lane padding handled by
            # Mosaic); batch axis tiled, ragged last block masked in-kernel.
            pl.BlockSpec((tile_n, c), lambda i: (i, 0)),
            pl.BlockSpec((tile_n, 1), lambda i: (i, 0)),
        ],
        out_specs=pl.BlockSpec((1, 1, 128), lambda i: (i, 0, 0)),
        compiler_params=pltpu.CompilerParams(
            dimension_semantics=("parallel",)),
        cost_estimate=cost,
    )(logits, targets2d)

    # Cross-tile reduction; divide by the *global* batch size (mean over N).
    return jnp.sum(partials) / n


def _reference(logits, targets, num_classes, epsilon):
    log_probs = jax.nn.log_softmax(logits.astype(jnp.float32), axis=1)
    onehot = jax.nn.one_hot(targets, num_classes, dtype=jnp.float32)
    smooth = (1.0 - epsilon) * onehot + epsilon / num_classes
    return jnp.sum(jnp.mean(-smooth * log_probs, axis=0))


if __name__ == "__main__":
    epsilon = 0.1
    key = jax.random.PRNGKey(0)
    k1, k2, k3, k4, k5, k6 = jax.random.split(key, 6)

    # Case 1: class count already a multiple of 128, single tile.
    n1, c1 = 8, 128
    logits1 = jax.random.normal(k1, (n1, c1), dtype=jnp.float32)
    targets1 = jax.random.randint(k2, (n1,), 0, c1, dtype=jnp.int32)
    loss1 = jax.block_until_ready(
        cross_entropy_label_smooth(logits1, targets1, c1, epsilon))
    ref1 = _reference(logits1, targets1, c1, epsilon)
    assert jnp.allclose(loss1, ref1, rtol=1e-5, atol=1e-5), (loss1, ref1)

    # Case 2: CIFAR-like small class count (C=10, not a lane multiple) and a
    # ragged batch split into 2 tiles (exercises ragged-row masking, the
    # non-128 class dim, and the cross-tile partial reduction).
    n2, c2 = 37, 10
    logits2 = jax.random.normal(k3, (n2, c2), dtype=jnp.float32)
    targets2 = jax.random.randint(k4, (n2,), 0, c2, dtype=jnp.int32)
    loss2 = jax.block_until_ready(
        cross_entropy_label_smooth(logits2, targets2, c2, epsilon))
    ref2 = _reference(logits2, targets2, c2, epsilon)
    assert jnp.allclose(loss2, ref2, rtol=1e-5, atol=1e-5), (loss2, ref2)

    # Case 3: bf16 logits (halved HBM traffic path), 2 tiles.
    n3, c3 = 64, 32
    logits3 = jax.random.normal(k5, (n3, c3), dtype=jnp.bfloat16)
    targets3 = jax.random.randint(k6, (n3,), 0, c3, dtype=jnp.int32)
    loss3 = jax.block_until_ready(
        cross_entropy_label_smooth(logits3, targets3, c3, epsilon))
    ref3 = _reference(logits3, targets3, c3, epsilon)
    assert jnp.allclose(loss3, ref3, rtol=1e-4, atol=1e-4), (loss3, ref3)

    print("KERNEL_OK")
</pallas_src>

<mosaic_0001>
module attributes {stable_mosaic.version = 11 : i64} {
  func.func @_ce_label_smooth_kernel(%arg0: i32, %arg1: memref<8x128xf32, #tpu.memory_space<vmem>>, %arg2: memref<8x1xi32, #tpu.memory_space<vmem>>, %arg3: memref<1x1x128xf32, #tpu.memory_space<vmem>>) attributes {dimension_semantics = [#tpu.dimension_semantics<parallel>], iteration_bounds = array<i64: 1>, scalar_prefetch = 0 : i64, scratch_operands = 0 : i64, tpu.core_type = #tpu.core_type<tc>, window_params = [{transform_indices = @transform_0, window_bounds = array<i64: 8, 128>}, {transform_indices = @transform_1, window_bounds = array<i64: 8, 1>}, {transform_indices = @transform_2, window_bounds = array<i64: 1, 1, 128>}]} {
    %c0 = arith.constant 0 : index
    %c0_0 = arith.constant 0 : index
    %0 = vector.load %arg1[%c0, %c0_0] : memref<8x128xf32, #tpu.memory_space<vmem>>, vector<8x128xf32>
    %c0_1 = arith.constant 0 : index
    %c0_2 = arith.constant 0 : index
    %1 = vector.load %arg2[%c0_1, %c0_2] : memref<8x1xi32, #tpu.memory_space<vmem>>, vector<8x1xi32>
    %cst = arith.constant dense<0xFF800000> : vector<8xf32>
    %2 = vector.multi_reduction <maximumf>, %0, %cst [1] : vector<8x128xf32> to vector<8xf32>
    %3 = vector.shape_cast %2 : vector<8xf32> to vector<8x1xf32>
    %4 = vector.broadcast %3 : vector<8x1xf32> to vector<8x128xf32>
    %5 = arith.subf %0, %4 : vector<8x128xf32>
    %6 = math.exp %5 : vector<8x128xf32>
    %cst_3 = arith.constant dense<0.000000e+00> : vector<8xf32>
    %7 = vector.multi_reduction <add>, %6, %cst_3 [1] : vector<8x128xf32> to vector<8xf32>
    %8 = vector.shape_cast %7 : vector<8xf32> to vector<8x1xf32>
    %9 = math.log %8 : vector<8x1xf32>
    %10 = tpu.iota {dimensions = array<i32: 1>} : vector<1x128xi32>
    %11 = vector.broadcast %10 : vector<1x128xi32> to vector<8x128xi32>
    %12 = vector.broadcast %1 : vector<8x1xi32> to vector<8x128xi32>
    %13 = arith.cmpi eq, %11, %12 : vector<8x128xi32>
    %cst_4 = arith.constant 0.900781273 : f32
    %cst_5 = arith.constant 7.812500e-04 : f32
    %14 = vector.broadcast %cst_4 : f32 to vector<8x128xf32>
    %15 = vector.broadcast %cst_5 : f32 to vector<8x128xf32>
    %16 = arith.select %13, %14, %15 : vector<8x128xi1>, vector<8x128xf32>
    %17 = arith.mulf %16, %5 : vector<8x128xf32>
    %cst_6 = arith.constant dense<0.000000e+00> : vector<8xf32>
    %18 = vector.multi_reduction <add>, %17, %cst_6 [1] : vector<8x128xf32> to vector<8xf32>
    %19 = vector.shape_cast %18 : vector<8xf32> to vector<8x1xf32>
    %20 = arith.subf %9, %19 : vector<8x1xf32>
    %21 = tpu.iota {dimensions = array<i32: 0>} : vector<8x1xi32>
    %c8_i32 = arith.constant 8 : i32
    %22 = arith.muli %arg0, %c8_i32 : i32
    %23 = vector.broadcast %22 : i32 to vector<8x1xi32>
    %24 = arith.addi %21, %23 : vector<8x1xi32>
    %c8_i32_7 = arith.constant 8 : i32
    %25 = vector.broadcast %c8_i32_7 : i32 to vector<8x1xi32>
    %26 = arith.cmpi slt, %24, %25 : vector<8x1xi32>
    %cst_8 = arith.constant 0.000000e+00 : f32
    %27 = vector.broadcast %cst_8 : f32 to vector<8x1xf32>
    %28 = arith.select %26, %20, %27 : vector<8x1xi1>, vector<8x1xf32>
    %29 = vector.shape_cast %28 : vector<8x1xf32> to vector<1x8x1xf32>
    %cst_9 = arith.constant dense<0.000000e+00> : vector<1xf32>
    %30 = vector.multi_reduction <add>, %29, %cst_9 [1, 2] : vector<1x8x1xf32> to vector<1xf32>
    %31 = vector.shape_cast %30 : vector<1xf32> to vector<1x1x1xf32>
    %32 = vector.extract %31[0, 0, 0] : f32 from vector<1x1x1xf32>
    %33 = tpu.iota {dimensions = array<i32: 2>} : vector<1x1x128xi32>
    %c0_i32 = arith.constant 0 : i32
    %34 = vector.broadcast %c0_i32 : i32 to vector<1x1x128xi32>
    %35 = arith.cmpi eq, %33, %34 : vector<1x1x128xi32>
    %cst_10 = arith.constant 0.000000e+00 : f32
    %36 = vector.broadcast %32 : f32 to vector<1x1x128xf32>
    %37 = vector.broadcast %cst_10 : f32 to vector<1x1x128xf32>
    %38 = arith.select %35, %36, %37 : vector<1x1x128xi1>, vector<1x1x128xf32>
    %c0_11 = arith.constant 0 : index
    %c0_12 = arith.constant 0 : index
    %c0_13 = arith.constant 0 : index
    %39 = vector.load %arg3[%c0_11, %c0_12, %c0_13] : memref<1x1x128xf32, #tpu.memory_space<vmem>>, vector<1x1x128xf32>
    tpu.vector_store %arg3[%c0_11, %c0_12, %c0_13], %38 {strides = array<i32>} : memref<1x1x128xf32, #tpu.memory_space<vmem>>, vector<1x1x128xf32>,
    return
  }
  func.func @transform_0(%arg0: i32) -> (i32, i32) {
    %c0_i32 = arith.constant 0 : i32
    %c0_i32_0 = arith.constant 0 : i32
    return %arg0, %c0_i32 : i32, i32
  }
  func.func @transform_1(%arg0: i32) -> (i32, i32) {
    %c0_i32 = arith.constant 0 : i32
    %c0_i32_0 = arith.constant 0 : i32
    return %arg0, %c0_i32 : i32, i32
  }
  func.func @transform_2(%arg0: i32) -> (i32, i32, i32) {
    %c0_i32 = arith.constant 0 : i32
    %c0_i32_0 = arith.constant 0 : i32
    %c0_i32_1 = arith.constant 0 : i32
    return %arg0, %c0_i32, %c0_i32_0 : i32, i32, i32
  }
}

</mosaic_0001>

<bundles_post_ra>
// kernel: tpu_custom_call.1
= control target key start
LH: loop header
LB: loop body
LE: loop exit
PB: predicated region body
PF: predicated region fallthrough
CT: control target
= control target key end

     0   :  { %s135_s0 = inlined_call_operand.vmem [shape: f32[8,128], index: 0, kind: input, shape index: {}]   ;;  %s136_s1 = inlined_call_operand.vmem [shape: s32[8,1], index: 1, kind: input, shape index: {}]   ;;  %s137_s2 = inlined_call_operand.hbm [shape: f32[1,1,128], index: 2, kind: output, shape index: {}]  }
   0x1   :  { %v12_v0 = vld [vmem:[%s135_s0] sm:$0xff] }
   0x2   :  { %7 = vsyncpa [#allocation3], 0  ;;  %14 = vmax.xlane.f32.xlu0 %v12_v0  ;;  %v108_v1 = vmov 0   ;;  %v13_v2 = vld [vmem:[%s136_s1] sm:$0xff]  ;;  %v23_v7 = vlaneseq  ;;  %v109_v10 = vmov 0.00078125  }
   0x3   :  { %77 = vset.pattern.permute.xlu0 %v108_v1  ;;  %vm41_vm1 = vcmask 7168   ;;  %s110_s0 = smov [#allocation2]   ;;  %s63_s15 = sshll.u32 %s137_s2, 4  ;;  %s64_s15 = int_to_ptr.hbm [resolvable:$true] %s63_s15 }
   0x4   :  { %v24_v8 = vand.u32 127, %v23_v7  ;;  %s61_s1 = sshll.u32 %s110_s0, 4  ;;  %s62_s1 = int_to_ptr.vmem [resolvable:$true] %s61_s1 }
   0x6   :  { %vm52_vm2 = vcmp.eq.s32.totalorder %v24_v8, 0 }
  0x16   :  { %26 = vperm.xlu0 %77, %v13_v2  }
  0x75   :  { %v15_v3 = vpop.xlane.xlu0 %14 }
  0x76   :  { %v16_v4 = vsub.f32 %v12_v0, %v15_v3 }
  0x78   :  { %v17_v5 = vmul.f32 1.442695, %v16_v4 }
  0x7a   :  { %78 = vpow2.f32 %v17_v5 }
  0x80   :  { %v79_v6 = vpop.eup %78 }
  0x81   :  { %19 = vadd.xlane.f32.xlu1 %v79_v6 }
  0x88   :  { %v27_v9 = vpop.permute.xlu0 %26 }
  0x89   :  { %vm28_vm0 = vcmp.eq.s32.totalorder %v24_v8, %v27_v9 }
  0x8a   :  { %v29_v11 = vsel %vm28_vm0, 0.9007813, %v109_v10 }
  0x8b   :  { %v30_v12 = vmul.f32 %v29_v11, %v16_v4 }
  0x8d   :  { %31 = vadd.xlane.f32.xlu1 %v30_v12 }
  0xf4   :  { %v20_v13 = vpop.xlane.xlu1 %19 }
  0xf5   :  { %80 = vlog2.f32 %v20_v13 }
  0xfb   :  { %v81_v14 = vpop.eup %80 }
  0xfc   :  { %v22_v15 = vmul.f32 0.6931472, %v81_v14 }
 0x100   :  { %v32_v16 = vpop.xlane.xlu1 %31 }
 0x101   :  { %v33_v17 = vsub.f32 %v22_v15, %v32_v16 }
 0x103   :  { %v42_v18 = vsel %vm41_vm1, %v33_v17, 0.0 }
 0x104   :  { %43 = vadd.xlane.f32.xlu2 %v42_v18 }
 0x177   :  { %v44_v19 = vpop.xlane.xlu2 %43 }
 0x178   :  { %v45_v20 = vrot.slane %v44_v19, 4 }
 0x17a   :  { %v46_v21 = vadd.f32 %v45_v20, %v44_v19 }
 0x17c   :  { %v47_v22 = vrot.slane %v46_v21, 2 }
 0x17e   :  { %v48_v23 = vadd.f32 %v47_v22, %v46_v21 }
 0x180   :  { %v49_v24 = vrot.slane %v48_v23, 1 }
 0x182   :  { %v50_v25 = vadd.f32 %v49_v24, %v48_v23 }
 0x184   :  { %72 = vpush %v50_v25 }
 0x1b5   :  { %s73_s16 = spop %72 }
 0x1b6   :  { %v53_v26 = vstv %s73_s16 }
 0x1b7   :  { %v54_v27 = vsel %vm52_vm2, %v53_v26, 0.0 }
 0x1b8   :  { %55 = vst [vmem:[#allocation2] sm:$0x1] %v54_v27 }
 0x1b9   :  { %66 = dma.vmem_to_hbm [thread:$0]  %s62_s1, 16, %s64_s15, [#allocation3]  }
 0x1ba   :  { %106 = dma.done.wait [#allocation3], 16  }
 0x1bb   :  { %107 = vsyncadd [#allocation3], 4294967280 }
 0x1bc   :  { %71 = vsyncpa [#allocation3], 1 }

</bundles_post_ra>
